<compile_context>
chip_gen: v5e
topology: v5e:2x2
jax: 0.10.0
libtpu: 0.0.40
codegen_flags: <defaults>
</compile_context>

<pallas_src>
import functools

import jax
import jax.numpy as jnp
from jax.experimental import pallas as pl
from jax.experimental.pallas import tpu as pltpu


LANE = 128      # lane-pad target for output / contraction dims
MAX_TM = 256    # dst-node tile (sublane axis of A / out)
MAX_TK = 512    # src-node tile (contraction axis); 256x512 bf16 tiles stay far under
                # v7x's 64 MiB VMEM even double-buffered


def _round_up(x, m):
    return (x + m - 1) // m * m


def _pick_tiles(m, k):
    """Pick (Mp, Kp, TM, TK): tile sizes + padded problem dims satisfying (8,128) rules."""
    tm = _round_up(m, 8) if m <= MAX_TM else MAX_TM
    mp = _round_up(m, tm)
    tk = _round_up(k, LANE) if k <= MAX_TK else MAX_TK
    kp = _round_up(k, tk)
    return mp, kp, tm, tk


def _matmul_bias_act_kernel(a_ref, xw_ref, b_ref, out_ref, *, apply_relu):
    """grid = (dst tiles [parallel], contraction tiles [arbitrary]).

    a_ref:   (TM, TK)  bf16  concatenated normalized-adjacency tile
    xw_ref:  (TK, NP)  bf16  concatenated (X_src @ W_r) tile, lane-padded to 128
    b_ref:   (1, NP)   f32   summed per-relation bias (lane-padded)
    out_ref: (TM, NP)  f32   resident output block; doubles as the f32 accumulator
    """
    k = pl.program_id(1)

    @pl.when(k == 0)
    def _():
        # Seed the resident accumulator with the summed bias -> no extra bias pass later.
        out_ref[...] = jnp.broadcast_to(b_ref[...], out_ref.shape)

    out_ref[...] += jnp.dot(a_ref[...], xw_ref[...],
                            preferred_element_type=jnp.float32)

    if apply_relu:
        @pl.when(k == pl.num_programs(1) - 1)
        def _():
            out_ref[...] = jnp.maximum(out_ref[...], 0.0)


def fused_adj_matmul(a_pad, xw_pad, b_pad, m, f_out, tm, tk, apply_relu):
    """out[:m, :f_out] of (A_cat @ XW_cat + b) (+ReLU), tiled over (dst, contraction)."""
    mp, kp = a_pad.shape
    np_ = xw_pad.shape[1]
    grid = (mp // tm, kp // tk)
    kernel = functools.partial(_matmul_bias_act_kernel, apply_relu=apply_relu)
    cost = pl.CostEstimate(
        flops=2 * mp * kp * np_,
        transcendentals=0,
        bytes_accessed=mp * kp * 2 + kp * np_ * 2 + mp * np_ * 4 + np_ * 4,
    )
    out = pl.pallas_call(
        kernel,
        out_shape=jax.ShapeDtypeStruct((mp, np_), jnp.float32),
        grid_spec=pltpu.PrefetchScalarGridSpec(
            num_scalar_prefetch=0,
            grid=grid,
            in_specs=[
                pl.BlockSpec((tm, tk), lambda i, k: (i, k)),     # adjacency tile
                pl.BlockSpec((tk, np_), lambda i, k: (k, 0)),    # XW tile
                pl.BlockSpec((1, np_), lambda i, k: (0, 0)),     # summed bias
            ],
            out_specs=pl.BlockSpec((tm, np_), lambda i, k: (i, 0)),
        ),
        compiler_params=pltpu.CompilerParams(
            dimension_semantics=("parallel", "arbitrary"),
            vmem_limit_bytes=48 << 20,
        ),
        cost_estimate=cost,
    )(a_pad, xw_pad, b_pad)
    return out[:m, :f_out]


def prepare_graph(rel_list, adjs):
    """Per-dst-type concatenated, padded, bf16 adjacency — built ONCE, reused by all layers.

    TODO(synk): sparse message passing is expressed as dense normalized-adjacency matmuls
    (semantically identical to DGL GraphConv norm='both').
    """
    by_dst = {}
    for i, (_, _, dt) in enumerate(rel_list):
        by_dst.setdefault(dt, []).append(i)
    prepared = {}
    for dt, idxs in by_dst.items():
        a_cat = jnp.concatenate([adjs[i] for i in idxs], axis=1)   # (N_dst, sum N_src)
        m, k = a_cat.shape
        mp, kp, tm, tk = _pick_tiles(m, k)
        a_pad = jnp.pad(a_cat.astype(jnp.bfloat16), ((0, mp - m), (0, kp - k)))
        prepared[dt] = dict(idxs=idxs, a=a_pad, m=m, k=k, tm=tm, tk=tk)
    return prepared


def hetero_graph_conv(prepared, rel_list, feats, weights, biases, f_out, apply_relu):
    """HeteroGraphConv({rel: GraphConv(norm='both')}, aggregate='sum') (+ fused ReLU)."""
    np_ = _round_up(f_out, LANE)
    out = {}
    for dt, g in prepared.items():
        idxs = g["idxs"]
        # Feature transform hoisted out of the kernel (tiny F_in contraction); concat the
        # per-relation results along the src axis so a single MXU matmul remains.
        xw = jnp.concatenate(
            [jnp.dot(feats[rel_list[i][0]], weights[i]) for i in idxs], axis=0)
        kp = g["a"].shape[1]
        xw_pad = jnp.pad(xw.astype(jnp.bfloat16),
                         ((0, kp - g["k"]), (0, np_ - f_out)))
        b_sum = sum(biases[i] for i in idxs)
        b_pad = jnp.pad(b_sum.reshape(1, -1).astype(jnp.float32),
                        ((0, 0), (0, np_ - f_out)))
        out[dt] = fused_adj_matmul(g["a"], xw_pad, b_pad, g["m"], f_out,
                                   g["tm"], g["tk"], apply_relu)
    return out


def rgcn_forward(prepared, rel_list, inputs, params):
    # conv1 -> ReLU (fused into the kernel epilogue) -> conv2
    hid = params["w1"][0].shape[1]
    out_f = params["w2"][0].shape[1]
    h = hetero_graph_conv(prepared, rel_list, inputs,
                          params["w1"], params["b1"], hid, apply_relu=True)
    h = hetero_graph_conv(prepared, rel_list, h,
                          params["w2"], params["b2"], out_f, apply_relu=False)
    return h


def ref_forward(rel_list, adjs, inputs, params):
    """Plain-JAX f32 reference of the same math, for verification."""
    def layer(feats, W, B):
        out = {}
        for i, (st, _, dt) in enumerate(rel_list):
            y = adjs[i] @ feats[st] @ W[i] + B[i]
            out[dt] = out.get(dt, 0.0) + y
        return out
    h = layer(inputs, params["w1"], params["b1"])
    h = {k: jnp.maximum(v, 0.0) for k, v in h.items()}
    return layer(h, params["w2"], params["b2"])


if __name__ == "__main__":
    key = jax.random.PRNGKey(0)
    N = 16                      # nodes per node type
    in_feats, hid_feats, out_feats = 8, 32, 16
    node_types = ["user", "item"]
    rel_list = [("user", "follows", "user"),
                ("user", "clicks", "item"),
                ("item", "clicked-by", "user")]
    R = len(rel_list)

    keys = jax.random.split(key, 16)

    # Synthetic heterograph: dense adjacency per relation, DGL 'both' normalization.
    adjs = []
    for i in range(R):
        a = (jax.random.uniform(keys[i], (N, N)) < 0.3).astype(jnp.float32)  # (dst, src)
        d_in = jnp.clip(a.sum(axis=1), 1.0, None)    # in-degree of dst nodes
        d_out = jnp.clip(a.sum(axis=0), 1.0, None)   # out-degree of src nodes
        a_norm = (d_in ** -0.5)[:, None] * a * (d_out ** -0.5)[None, :]
        adjs.append(a_norm)

    # Node features.
    inputs = {nt: jax.random.normal(keys[4 + j], (N, in_feats), jnp.float32)
              for j, nt in enumerate(node_types)}

    # Per-relation GraphConv parameters (same shapes as DGL GraphConv).
    w1 = [jax.random.normal(keys[6 + i], (in_feats, hid_feats), jnp.float32) * 0.1
          for i in range(R)]
    b1 = [jnp.full((hid_feats,), 0.01 * (i + 1), jnp.float32) for i in range(R)]
    w2 = [jax.random.normal(keys[9 + i], (hid_feats, out_feats), jnp.float32) * 0.1
          for i in range(R)]
    b2 = [jnp.full((out_feats,), 0.02 * (i + 1), jnp.float32) for i in range(R)]
    params = {"w1": w1, "b1": b1, "w2": w2, "b2": b2}

    # Graph preprocessing (concat + pad + bf16 cast) done ONCE, reused by both layers.
    prepared = prepare_graph(rel_list, adjs)

    out = rgcn_forward(prepared, rel_list, inputs, params)
    out = {k: jax.block_until_ready(v) for k, v in out.items()}

    ref = ref_forward(rel_list, adjs, inputs, params)
    for k in out:
        assert out[k].shape == (N, out_feats) and out[k].dtype == jnp.float32
        # bf16 adjacency / XW inputs (f32 accumulation) -> relaxed tolerance vs f32 ref.
        assert jnp.allclose(out[k], ref[k], atol=2e-2, rtol=2e-2), k

    print("KERNEL_OK")
</pallas_src>

<mosaic_0001>
module attributes {stable_mosaic.version = 11 : i64} {
  func.func @_matmul_bias_act_kernel(%arg0: i32, %arg1: i32, %arg2: memref<16x128xbf16, #tpu.memory_space<vmem>>, %arg3: memref<128x128xbf16, #tpu.memory_space<vmem>>, %arg4: memref<1x128xf32, #tpu.memory_space<vmem>>, %arg5: memref<16x128xf32, #tpu.memory_space<vmem>>) attributes {dimension_semantics = [#tpu.dimension_semantics<parallel>, #tpu.dimension_semantics<arbitrary>], iteration_bounds = array<i64: 1, 1>, scalar_prefetch = 0 : i64, scratch_operands = 0 : i64, tpu.core_type = #tpu.core_type<tc>, window_params = [{transform_indices = @transform_0, window_bounds = array<i64: 16, 128>}, {transform_indices = @transform_1, window_bounds = array<i64: 128, 128>}, {pipeline_mode = #tpu.pipeline_mode<synchronous>, transform_indices = @transform_2, window_bounds = array<i64: 1, 128>}, {transform_indices = @transform_3, window_bounds = array<i64: 16, 128>}]} {
    %c0_i32 = arith.constant 0 : i32
    %0 = arith.cmpi eq, %arg1, %c0_i32 : i32
    %1 = arith.extui %0 : i1 to i32
    %c0_i32_0 = arith.constant 0 : i32
    %2 = arith.cmpi ne, %1, %c0_i32_0 : i32
    scf.if %2 {
      %c0_10 = arith.constant 0 : index
      %c0_11 = arith.constant 0 : index
      %12 = vector.load %arg4[%c0_10, %c0_11] : memref<1x128xf32, #tpu.memory_space<vmem>>, vector<1x128xf32>
      %13 = vector.shape_cast %12 : vector<1x128xf32> to vector<1x128xf32>
      %14 = vector.broadcast %13 : vector<1x128xf32> to vector<16x128xf32>
      %c0_12 = arith.constant 0 : index
      %c0_13 = arith.constant 0 : index
      %15 = vector.load %arg5[%c0_12, %c0_13] : memref<16x128xf32, #tpu.memory_space<vmem>>, vector<16x128xf32>
      tpu.vector_store %arg5[%c0_12, %c0_13], %14 {strides = array<i32>} : memref<16x128xf32, #tpu.memory_space<vmem>>, vector<16x128xf32>,
    } else {
    }
    %c0 = arith.constant 0 : index
    %c0_1 = arith.constant 0 : index
    %3 = vector.load %arg5[%c0, %c0_1] : memref<16x128xf32, #tpu.memory_space<vmem>>, vector<16x128xf32>
    %c0_2 = arith.constant 0 : index
    %c0_3 = arith.constant 0 : index
    %4 = vector.load %arg2[%c0_2, %c0_3] : memref<16x128xbf16, #tpu.memory_space<vmem>>, vector<16x128xbf16>
    %c0_4 = arith.constant 0 : index
    %c0_5 = arith.constant 0 : index
    %5 = vector.load %arg3[%c0_4, %c0_5] : memref<128x128xbf16, #tpu.memory_space<vmem>>, vector<128x128xbf16>
    %cst = arith.constant dense<0.000000e+00> : vector<16x128xf32>
    %6 = tpu.matmul %4, %5, %cst {dimension_numbers = #tpu.dot_dimension_numbers<[1], [0], [0], [1], [0, 0, 1, 1], [], []>} : vector<16x128xbf16>, vector<128x128xbf16>, vector<16x128xf32> -> vector<16x128xf32>
    %7 = arith.addf %3, %6 : vector<16x128xf32>
    %c0_6 = arith.constant 0 : index
    %c0_7 = arith.constant 0 : index
    %8 = vector.load %arg5[%c0_6, %c0_7] : memref<16x128xf32, #tpu.memory_space<vmem>>, vector<16x128xf32>
    tpu.vector_store %arg5[%c0_6, %c0_7], %7 {strides = array<i32>} : memref<16x128xf32, #tpu.memory_space<vmem>>, vector<16x128xf32>,
    %c0_i32_8 = arith.constant 0 : i32
    %9 = arith.cmpi eq, %arg1, %c0_i32_8 : i32
    %10 = arith.extui %9 : i1 to i32
    %c0_i32_9 = arith.constant 0 : i32
    %11 = arith.cmpi ne, %10, %c0_i32_9 : i32
    scf.if %11 {
      %c0_10 = arith.constant 0 : index
      %c0_11 = arith.constant 0 : index
      %12 = vector.load %arg5[%c0_10, %c0_11] : memref<16x128xf32, #tpu.memory_space<vmem>>, vector<16x128xf32>
      %cst_12 = arith.constant 0.000000e+00 : f32
      %13 = vector.broadcast %cst_12 : f32 to vector<16x128xf32>
      %14 = arith.maximumf %12, %13 : vector<16x128xf32>
      %c0_13 = arith.constant 0 : index
      %c0_14 = arith.constant 0 : index
      %15 = vector.load %arg5[%c0_13, %c0_14] : memref<16x128xf32, #tpu.memory_space<vmem>>, vector<16x128xf32>
      tpu.vector_store %arg5[%c0_13, %c0_14], %14 {strides = array<i32>} : memref<16x128xf32, #tpu.memory_space<vmem>>, vector<16x128xf32>,
    } else {
    }
    return
  }
  func.func @transform_0(%arg0: i32, %arg1: i32) -> (i32, i32) {
    %c0_i32 = arith.constant 0 : i32
    return %arg0, %arg1 : i32, i32
  }
  func.func @transform_1(%arg0: i32, %arg1: i32) -> (i32, i32) {
    %c0_i32 = arith.constant 0 : i32
    %c0_i32_0 = arith.constant 0 : i32
    return %arg1, %c0_i32 : i32, i32
  }
  func.func @transform_2(%arg0: i32, %arg1: i32) -> (i32, i32) {
    %c0_i32 = arith.constant 0 : i32
    %c0_i32_0 = arith.constant 0 : i32
    %c0_i32_1 = arith.constant 0 : i32
    return %c0_i32, %c0_i32_0 : i32, i32
  }
  func.func @transform_3(%arg0: i32, %arg1: i32) -> (i32, i32) {
    %c0_i32 = arith.constant 0 : i32
    %c0_i32_0 = arith.constant 0 : i32
    return %arg0, %c0_i32 : i32, i32
  }
}

</mosaic_0001>

<bundles_post_ra>
// kernel: tpu_custom_call.1
= control target key start
LH: loop header
LB: loop body
LE: loop exit
PB: predicated region body
PF: predicated region fallthrough
CT: control target
= control target key end

     0   :  { %8 = vsyncpa [#allocation3], 0  ;;  %s348_s0 = inlined_call_operand.hbm [shape: bf16[16,128], index: 0, kind: input, shape index: {}]   ;;  %s349_s1 = inlined_call_operand.hbm [shape: bf16[128,128], index: 1, kind: input, shape index: {}]   ;;  %s350_s2 = inlined_call_operand.vmem [shape: f32[1,128], index: 2, kind: input, shape index: {}]   ;;  %s351_s3 = inlined_call_operand.hbm [shape: f32[16,128], index: 3, kind: output, shape index: {}]  }
   0x1   :  { %9 = vsyncpa [#allocation6], 0 }
   0x2   :  { %10 = vsyncpa [#allocation4], 0  ;;  %s15_s14 = sshll.u32 %s348_s0, 4  ;;  %s309_s15 = smov [#allocation2]   ;;  %s16_s14 = int_to_ptr.hbm [resolvable:$true] %s15_s14 }
   0x3   :  { %s17_s16 = sshll.u32 %s309_s15, 4  ;;  %s28_s19 = sshll.u32 %s349_s1, 4  ;;  %s18_s16 = int_to_ptr.vmem [resolvable:$true] %s17_s16  ;;  %s29_s19 = int_to_ptr.hbm [resolvable:$true] %s28_s19 }
   0x4   :  { %s310_s20 = smov 64   ;;  %s311_s21 = smov 4  }
   0x5   :  { %23 = dma.hbm_to_vmem [thread:$0]  %s16_s14, 128, %s18_s16, [#allocation3], %s310_s20, %s310_s20, %s311_s21  }
   0x6   :  { %s312_s22 = smov [#allocation5]  }
   0x7   :  { %s30_s23 = sshll.u32 %s312_s22, 4  ;;  %s31_s23 = int_to_ptr.vmem [resolvable:$true] %s30_s23 }
   0x8   :  { %36 = dma.hbm_to_vmem [thread:$0]  %s29_s19, 1024, %s31_s23, [#allocation6], %s310_s20, %s310_s20, %s311_s21  }
   0x9   :  { %303 = dma.done.wait [#allocation3], 128  }
   0xa   :  { %304 = vsyncadd [#allocation3], 4294967168 }
   0xb   :  { %305 = dma.done.wait [#allocation6], 1024  }
   0xc   :  { %306 = vsyncadd [#allocation6], 4294966272  ;;  %v222_v0 = vld [vmem:[#allocation5 + $0x38] sm:$0xff]  ;;  %v221_v1 = vld [vmem:[#allocation5 + $0x30] sm:$0xff]  ;;  %s313_s24 = smov [#allocation7]   ;;  %s164_s28 = sshll.u32 %s351_s3, 4  ;;  %s165_s28 = int_to_ptr.hbm [resolvable:$true] %s164_s28 }
   0xd   :  { %131 = vmatpush.bf16.msra.mxu0 %v222_v0  ;;  %v220_v2 = vld [vmem:[#allocation5 + $0x28] sm:$0xff]  ;;  %v219_v3 = vld [vmem:[#allocation5 + $0x20] sm:$0xff]  ;;  %v218_v4 = vld [vmem:[#allocation5 + $0x18] sm:$0xff]  ;;  %s162_s25 = sshll.u32 %s313_s24, 4  ;;  %s314_s29 = smov 128   ;;  %s163_s25 = int_to_ptr.vmem [resolvable:$true] %s162_s25 }
   0xe   :  { %v217_v5 = vld [vmem:[#allocation5 + $0x10] sm:$0xff]  ;;  %v216_v6 = vld [vmem:[#allocation5 + $0x8] sm:$0xff]  ;;  %v215_v7 = vld [vmem:[#allocation5] sm:$0xff]  ;;  %s315_s30 = smov 8  }
   0xf   :  { %v214_v8 = vld [vmem:[#allocation2] sm:$0xff] }
  0x10   :  { %v230_v9 = vld [vmem:[%s350_s2] ss:$0 sm:$0xff] }
  0x11   :  { %132 = vmatpush.bf16.msra.mxu0 %v221_v1 }
  0x15   :  { %133 = vmatpush.bf16.msra.mxu0 %v220_v2 }
  0x19   :  { %134 = vmatpush.bf16.msra.mxu0 %v219_v3 }
  0x1d   :  { %135 = vmatpush.bf16.msra.mxu0 %v218_v4 }
  0x21   :  { %136 = vmatpush.bf16.msra.mxu0 %v217_v5 }
  0x25   :  { %137 = vmatpush.bf16.msra.mxu0 %v216_v6 }
  0x29   :  { %138 = vmatpush.bf16.msra.mxu0 %v215_v7 }
  0x2c   :  { %139 = vmatmul.bf16.vlgmr.msra.gmra.mxu0 %v214_v8 }
  0xa9   :  { %v140_v10 = vpop.f32.mrf.mxu0 }
  0xaa   :  { %v145_v11 = vadd.f32 %v230_v9, %v140_v10 }
  0xac   :  { %v154_v12 = vmax.f32 %v145_v11, 0.0 }
  0xae   :  { %156 = vst [vmem:[#allocation7] sm:$0xff] %v154_v12 }
  0xb1   :  { %v142_v13 = vpop.f32.mrf.mxu0 }
  0xb2   :  { %v146_v14 = vadd.f32 %v230_v9, %v142_v13 }
  0xb4   :  { %v155_v15 = vmax.f32 %v146_v14, 0.0 }
  0xb6   :  { %157 = vst [vmem:[#allocation7 + $0x8] sm:$0xff] %v155_v15 }
  0xb7   :  { %170 = dma.vmem_to_hbm [thread:$0]  %s163_s25, 256, %s165_s28, [#allocation4], %s314_s29, %s314_s29, %s315_s30  }
  0xb8   :  { %307 = dma.done.wait [#allocation4], 256  }
  0xb9   :  { %308 = vsyncadd [#allocation4], 4294967040 }
  0xba   :  { %175 = vsyncpa [#allocation3], 1 }
  0xbb   :  { %176 = vsyncpa [#allocation6], 1 }
  0xbc   :  { %177 = vsyncpa [#allocation4], 1 }

</bundles_post_ra>
